<compile_context>
chip_gen: v7x
topology: tpu7x:2x2x1
jax: 0.10.0
libtpu: 0.0.40
codegen_flags: <defaults>
</compile_context>

<pallas_src>
import functools
import math

import jax
import jax.numpy as jnp
from jax.experimental import pallas as pl
from jax.experimental.pallas import tpu as pltpu


def _concat_kernel(a0_ref, v0_ref, a1_ref, v1_ref, a_ref, v_ref, *,
                   n0, crop0, crop1):
    """Copy one (batch, output-channel-block) tile of activations + poses.

    Grid = (B, n0 + n1).  Output channel block `co < n0` comes from capsule
    input 0, otherwise from capsule input 1.  `crop0` / `crop1` are *static*
    slices on the trailing two (spatial) dims of the input tiles; in the
    equal-size (flattened, lane-dense) mode they select the full tile and are
    free.
    """
    co = pl.program_id(1)
    lead_a = (slice(None), slice(None))                 # (1, Cblk)
    lead_v = (slice(None), slice(None), slice(None))    # (1, Cblk, P)

    @pl.when(co < n0)
    def _():
        a_ref[...] = a0_ref[lead_a + crop0]
        v_ref[...] = v0_ref[lead_v + crop0]

    @pl.when(co >= n0)
    def _():
        a_ref[...] = a1_ref[lead_a + crop1]
        v_ref[...] = v1_ref[lead_v + crop1]


def _pick_channel_block(c_gcd, per_channel_bytes, budget_bytes=4 * 1024 * 1024):
    """Largest divisor of gcd(C0, C1) whose double-buffered tiles fit budget."""
    best = 1
    for d in range(1, c_gcd + 1):
        if c_gcd % d == 0 and 2 * d * per_channel_bytes <= budget_bytes:
            best = d
    return best


def capsule_concat(caps0, caps1):
    """JAX/Pallas equivalent of CapsuleConcat.forward.

    caps_i = (a_i, v_i) with a_i: (B, C_i, H_i, W_i), v_i: (B, C_i, P, H_i, W_i).
    Returns (a, v): a (B, C0+C1, tH, tW), v (B, C0+C1, P, tH, tW).
    """
    a0, v0 = caps0
    a1, v1 = caps1
    B, C0, P, H0, W0 = v0.shape
    _, C1, P1, H1, W1 = v1.shape
    assert P == P1, "pose dims must match (implicit assumption of the module)"
    assert a0.dtype == a1.dtype == v0.dtype == v1.dtype
    dtype = v0.dtype

    if (H0 == H1) and (W0 == W1):
        # --- no-crop fast path: flatten spatial (free reshape) -> lane-dense.
        tH, tW = H1, W1
        hw = tH * tW
        a0k = a0.reshape(B, C0, 1, hw)
        a1k = a1.reshape(B, C1, 1, hw)
        v0k = v0.reshape(B, C0, P, 1, hw)
        v1k = v1.reshape(B, C1, P, 1, hw)
        sp0 = sp1 = spo = (1, hw)
        crop0 = crop1 = (slice(0, 1), slice(0, hw))     # full tile, no masking
    else:
        # --- center-crop path: keep full (H, W) tiles, crop as a static slice.
        tH, tW = min(H0, H1), min(W0, W1)
        dh0, dw0 = (H0 - tH) // 2, (W0 - tW) // 2
        dh1, dw1 = (H1 - tH) // 2, (W1 - tW) // 2
        a0k, a1k, v0k, v1k = a0, a1, v0, v1
        sp0, sp1, spo = (H0, W0), (H1, W1), (tH, tW)
        crop0 = (slice(dh0, dh0 + tH), slice(dw0, dw0 + tW))
        crop1 = (slice(dh1, dh1 + tH), slice(dw1, dw1 + tW))

    # Channel block: largest divisor of gcd(C0, C1) that keeps the
    # double-buffered per-step working set small (v7x-safe VMEM budget).
    itemsize = jnp.dtype(dtype).itemsize
    per_channel_bytes = itemsize * (P + 1) * (
        sp0[0] * sp0[1] + sp1[0] * sp1[1] + spo[0] * spo[1])
    cblk = _pick_channel_block(math.gcd(C0, C1), per_channel_bytes)
    n0, n1 = C0 // cblk, C1 // cblk
    grid = (B, n0 + n1)

    # Input index maps clamp so the "inactive" source keeps its previous block
    # index -> no redundant DMA while the other source's channels are copied.
    def in0_map_a(b, co):
        return (b, jnp.minimum(co, n0 - 1), 0, 0)

    def in0_map_v(b, co):
        return (b, jnp.minimum(co, n0 - 1), 0, 0, 0)

    def in1_map_a(b, co):
        return (b, jnp.maximum(co - n0, 0), 0, 0)

    def in1_map_v(b, co):
        return (b, jnp.maximum(co - n0, 0), 0, 0, 0)

    # Output blocks land directly at their final channel offset (source 1's
    # blocks start at channel C0) -> concat happens "for free" in the DMA out.
    def out_map_a(b, co):
        return (b, co, 0, 0)

    def out_map_v(b, co):
        return (b, co, 0, 0, 0)

    in_specs = [
        pl.BlockSpec((1, cblk) + sp0, in0_map_a),
        pl.BlockSpec((1, cblk, P) + sp0, in0_map_v),
        pl.BlockSpec((1, cblk) + sp1, in1_map_a),
        pl.BlockSpec((1, cblk, P) + sp1, in1_map_v),
    ]
    out_specs = (
        pl.BlockSpec((1, cblk) + spo, out_map_a),
        pl.BlockSpec((1, cblk, P) + spo, out_map_v),
    )
    out_shape = (
        jax.ShapeDtypeStruct((B, C0 + C1) + spo, dtype),
        jax.ShapeDtypeStruct((B, C0 + C1, P) + spo, dtype),
    )

    kernel = functools.partial(_concat_kernel, n0=n0, crop0=crop0, crop1=crop1)
    a_out, v_out = pl.pallas_call(
        kernel,
        grid=grid,
        in_specs=in_specs,
        out_specs=out_specs,
        out_shape=out_shape,
        compiler_params=pltpu.CompilerParams(
            dimension_semantics=("parallel", "parallel"),
            vmem_limit_bytes=32 * 1024 * 1024,
        ),
    )(a0k, v0k, a1k, v1k)

    # Restore canonical capsule layout (free reshapes).
    a_out = a_out.reshape(B, C0 + C1, tH, tW)
    v_out = v_out.reshape(B, C0 + C1, P, tH, tW)
    return a_out, v_out


def _reference(caps0, caps1):
    """Pure-JAX reference mirroring the PyTorch code path."""
    a0, v0 = caps0
    a1, v1 = caps1
    H0, W0 = v0.shape[-2:]
    H1, W1 = v1.shape[-2:]
    if not ((H0 == H1) and (W0 == W1)):
        tH, tW = min(H0, H1), min(W0, W1)
        dh0, dw0 = (H0 - tH) // 2, (W0 - tW) // 2
        dh1, dw1 = (H1 - tH) // 2, (W1 - tW) // 2
        a0 = a0[:, :, dh0:dh0 + tH, dw0:dw0 + tW]
        v0 = v0[:, :, :, dh0:dh0 + tH, dw0:dw0 + tW]
        a1 = a1[:, :, dh1:dh1 + tH, dw1:dw1 + tW]
        v1 = v1[:, :, :, dh1:dh1 + tH, dw1:dw1 + tW]
    return (jnp.concatenate([a0, a1], axis=1),
            jnp.concatenate([v0, v1], axis=1))


if __name__ == "__main__":
    key = jax.random.PRNGKey(0)
    k0a, k0v, k1a, k1v, k2a, k2v = jax.random.split(key, 6)

    B, C0, C1, P = 2, 4, 6, 8

    # --- case 1: different spatial sizes -> exercises the center-crop path.
    H0, W0 = 16, 16
    H1, W1 = 12, 12
    a0 = jax.random.normal(k0a, (B, C0, H0, W0), dtype=jnp.float32)
    v0 = jax.random.normal(k0v, (B, C0, P, H0, W0), dtype=jnp.float32)
    a1 = jax.random.normal(k1a, (B, C1, H1, W1), dtype=jnp.float32)
    v1 = jax.random.normal(k1v, (B, C1, P, H1, W1), dtype=jnp.float32)

    a, v = capsule_concat((a0, v0), (a1, v1))
    jax.block_until_ready((a, v))
    a_ref, v_ref = _reference((a0, v0), (a1, v1))
    assert a.shape == a_ref.shape and v.shape == v_ref.shape
    assert jnp.array_equal(a, a_ref), "activation mismatch (crop path)"
    assert jnp.array_equal(v, v_ref), "pose mismatch (crop path)"

    # --- case 2: equal spatial sizes -> exercises the lane-dense flat path.
    a0e = jax.random.normal(k2a, (B, C0, H1, W1), dtype=jnp.float32)
    v0e = jax.random.normal(k2v, (B, C0, P, H1, W1), dtype=jnp.float32)

    ae, ve = capsule_concat((a0e, v0e), (a1, v1))
    jax.block_until_ready((ae, ve))
    ae_ref, ve_ref = _reference((a0e, v0e), (a1, v1))
    assert jnp.array_equal(ae, ae_ref), "activation mismatch (equal-size path)"
    assert jnp.array_equal(ve, ve_ref), "pose mismatch (equal-size path)"

    print("KERNEL_OK")
</pallas_src>

<mosaic_0001>
module attributes {stable_mosaic.version = 11 : i64} {
  func.func @_concat_kernel(%arg0: i32, %arg1: i32, %arg2: memref<1x2x16x16xf32, #tpu.memory_space<vmem>>, %arg3: memref<1x2x8x16x16xf32, #tpu.memory_space<vmem>>, %arg4: memref<1x2x12x12xf32, #tpu.memory_space<vmem>>, %arg5: memref<1x2x8x12x12xf32, #tpu.memory_space<vmem>>, %arg6: memref<1x2x12x12xf32, #tpu.memory_space<vmem>>, %arg7: memref<1x2x8x12x12xf32, #tpu.memory_space<vmem>>) attributes {dimension_semantics = [#tpu.dimension_semantics<parallel>, #tpu.dimension_semantics<parallel>], iteration_bounds = array<i64: 2, 5>, scalar_prefetch = 0 : i64, scratch_operands = 0 : i64, tpu.core_type = #tpu.core_type<tc>, window_params = [{transform_indices = @transform_0, window_bounds = array<i64: 1, 2, 16, 16>}, {transform_indices = @transform_1, window_bounds = array<i64: 1, 2, 8, 16, 16>}, {transform_indices = @transform_2, window_bounds = array<i64: 1, 2, 12, 12>}, {transform_indices = @transform_3, window_bounds = array<i64: 1, 2, 8, 12, 12>}, {transform_indices = @transform_4, window_bounds = array<i64: 1, 2, 12, 12>}, {transform_indices = @transform_5, window_bounds = array<i64: 1, 2, 8, 12, 12>}]} {
    %c2_i32 = arith.constant 2 : i32
    %0 = arith.cmpi slt, %arg1, %c2_i32 : i32
    %1 = arith.extui %0 : i1 to i32
    %c0_i32 = arith.constant 0 : i32
    %2 = arith.cmpi ne, %1, %c0_i32 : i32
    scf.if %2 {
      %c0 = arith.constant 0 : index
      %c0_2 = arith.constant 0 : index
      %c2 = arith.constant 2 : index
      %c2_3 = arith.constant 2 : index
      %6 = vector.load %arg2[%c0, %c0_2, %c2, %c2_3] : memref<1x2x16x16xf32, #tpu.memory_space<vmem>>, vector<1x2x12x12xf32>
      %c0_4 = arith.constant 0 : index
      %c0_5 = arith.constant 0 : index
      %c0_6 = arith.constant 0 : index
      %c0_7 = arith.constant 0 : index
      %7 = vector.load %arg6[%c0_4, %c0_5, %c0_6, %c0_7] : memref<1x2x12x12xf32, #tpu.memory_space<vmem>>, vector<1x2x12x12xf32>
      tpu.vector_store %arg6[%c0_4, %c0_5, %c0_6, %c0_7], %6 {strides = array<i32>} : memref<1x2x12x12xf32, #tpu.memory_space<vmem>>, vector<1x2x12x12xf32>,
      %c0_8 = arith.constant 0 : index
      %c0_9 = arith.constant 0 : index
      %c0_10 = arith.constant 0 : index
      %c2_11 = arith.constant 2 : index
      %c2_12 = arith.constant 2 : index
      %8 = vector.load %arg3[%c0_8, %c0_9, %c0_10, %c2_11, %c2_12] : memref<1x2x8x16x16xf32, #tpu.memory_space<vmem>>, vector<1x2x8x12x12xf32>
      %c0_13 = arith.constant 0 : index
      %c0_14 = arith.constant 0 : index
      %c0_15 = arith.constant 0 : index
      %c0_16 = arith.constant 0 : index
      %c0_17 = arith.constant 0 : index
      %9 = vector.load %arg7[%c0_13, %c0_14, %c0_15, %c0_16, %c0_17] : memref<1x2x8x12x12xf32, #tpu.memory_space<vmem>>, vector<1x2x8x12x12xf32>
      tpu.vector_store %arg7[%c0_13, %c0_14, %c0_15, %c0_16, %c0_17], %8 {strides = array<i32>} : memref<1x2x8x12x12xf32, #tpu.memory_space<vmem>>, vector<1x2x8x12x12xf32>,
    } else {
    }
    %c2_i32_0 = arith.constant 2 : i32
    %3 = arith.cmpi sge, %arg1, %c2_i32_0 : i32
    %4 = arith.extui %3 : i1 to i32
    %c0_i32_1 = arith.constant 0 : i32
    %5 = arith.cmpi ne, %4, %c0_i32_1 : i32
    scf.if %5 {
      %c0 = arith.constant 0 : index
      %c0_2 = arith.constant 0 : index
      %c0_3 = arith.constant 0 : index
      %c0_4 = arith.constant 0 : index
      %6 = vector.load %arg4[%c0, %c0_2, %c0_3, %c0_4] : memref<1x2x12x12xf32, #tpu.memory_space<vmem>>, vector<1x2x12x12xf32>
      %c0_5 = arith.constant 0 : index
      %c0_6 = arith.constant 0 : index
      %c0_7 = arith.constant 0 : index
      %c0_8 = arith.constant 0 : index
      %7 = vector.load %arg6[%c0_5, %c0_6, %c0_7, %c0_8] : memref<1x2x12x12xf32, #tpu.memory_space<vmem>>, vector<1x2x12x12xf32>
      tpu.vector_store %arg6[%c0_5, %c0_6, %c0_7, %c0_8], %6 {strides = array<i32>} : memref<1x2x12x12xf32, #tpu.memory_space<vmem>>, vector<1x2x12x12xf32>,
      %c0_9 = arith.constant 0 : index
      %c0_10 = arith.constant 0 : index
      %c0_11 = arith.constant 0 : index
      %c0_12 = arith.constant 0 : index
      %c0_13 = arith.constant 0 : index
      %8 = vector.load %arg5[%c0_9, %c0_10, %c0_11, %c0_12, %c0_13] : memref<1x2x8x12x12xf32, #tpu.memory_space<vmem>>, vector<1x2x8x12x12xf32>
      %c0_14 = arith.constant 0 : index
      %c0_15 = arith.constant 0 : index
      %c0_16 = arith.constant 0 : index
      %c0_17 = arith.constant 0 : index
      %c0_18 = arith.constant 0 : index
      %9 = vector.load %arg7[%c0_14, %c0_15, %c0_16, %c0_17, %c0_18] : memref<1x2x8x12x12xf32, #tpu.memory_space<vmem>>, vector<1x2x8x12x12xf32>
      tpu.vector_store %arg7[%c0_14, %c0_15, %c0_16, %c0_17, %c0_18], %8 {strides = array<i32>} : memref<1x2x8x12x12xf32, #tpu.memory_space<vmem>>, vector<1x2x8x12x12xf32>,
    } else {
    }
    return
  }
  func.func @transform_0(%arg0: i32, %arg1: i32) -> (i32, i32, i32, i32) {
    %c1_i32 = arith.constant 1 : i32
    %0 = arith.minsi %arg1, %c1_i32 : i32
    %c0_i32 = arith.constant 0 : i32
    %c0_i32_0 = arith.constant 0 : i32
    %c0_i32_1 = arith.constant 0 : i32
    return %arg0, %0, %c0_i32, %c0_i32_0 : i32, i32, i32, i32
  }
  func.func @transform_1(%arg0: i32, %arg1: i32) -> (i32, i32, i32, i32, i32) {
    %c1_i32 = arith.constant 1 : i32
    %0 = arith.minsi %arg1, %c1_i32 : i32
    %c0_i32 = arith.constant 0 : i32
    %c0_i32_0 = arith.constant 0 : i32
    %c0_i32_1 = arith.constant 0 : i32
    %c0_i32_2 = arith.constant 0 : i32
    return %arg0, %0, %c0_i32, %c0_i32_0, %c0_i32_1 : i32, i32, i32, i32, i32
  }
  func.func @transform_2(%arg0: i32, %arg1: i32) -> (i32, i32, i32, i32) {
    %c2_i32 = arith.constant 2 : i32
    %0 = arith.subi %arg1, %c2_i32 : i32
    %c0_i32 = arith.constant 0 : i32
    %1 = arith.maxsi %0, %c0_i32 : i32
    %c0_i32_0 = arith.constant 0 : i32
    %c0_i32_1 = arith.constant 0 : i32
    %c0_i32_2 = arith.constant 0 : i32
    return %arg0, %1, %c0_i32_0, %c0_i32_1 : i32, i32, i32, i32
  }
  func.func @transform_3(%arg0: i32, %arg1: i32) -> (i32, i32, i32, i32, i32) {
    %c2_i32 = arith.constant 2 : i32
    %0 = arith.subi %arg1, %c2_i32 : i32
    %c0_i32 = arith.constant 0 : i32
    %1 = arith.maxsi %0, %c0_i32 : i32
    %c0_i32_0 = arith.constant 0 : i32
    %c0_i32_1 = arith.constant 0 : i32
    %c0_i32_2 = arith.constant 0 : i32
    %c0_i32_3 = arith.constant 0 : i32
    return %arg0, %1, %c0_i32_0, %c0_i32_1, %c0_i32_2 : i32, i32, i32, i32, i32
  }
  func.func @transform_4(%arg0: i32, %arg1: i32) -> (i32, i32, i32, i32) {
    %c0_i32 = arith.constant 0 : i32
    %c0_i32_0 = arith.constant 0 : i32
    %c0_i32_1 = arith.constant 0 : i32
    return %arg0, %arg1, %c0_i32, %c0_i32_0 : i32, i32, i32, i32
  }
  func.func @transform_5(%arg0: i32, %arg1: i32) -> (i32, i32, i32, i32, i32) {
    %c0_i32 = arith.constant 0 : i32
    %c0_i32_0 = arith.constant 0 : i32
    %c0_i32_1 = arith.constant 0 : i32
    %c0_i32_2 = arith.constant 0 : i32
    return %arg0, %arg1, %c0_i32, %c0_i32_0, %c0_i32_1 : i32, i32, i32, i32, i32
  }
}

</mosaic_0001>

<bundles_post_ra>
// kernel: tpu_custom_call.1
= control target key start
LH: loop header
LB: loop body
LE: loop exit
PB: predicated region body
PF: predicated region fallthrough
CT: control target
= control target key end

     0   :  { %s1151_s18 = smov 0   ;;  %s1153_s19 = smov 0   ;;  %s1494_s0 = inlined_call_operand.vmem [shape: f32[2,4,16,16], index: 0, kind: input, shape index: {}]   ;;  %s1495_s1 = inlined_call_operand.vmem [shape: f32[2,4,8,16,16], index: 1, kind: input, shape index: {}]   ;;  %s1496_s2 = inlined_call_operand.vmem [shape: f32[2,6,12,12], index: 2, kind: input, shape index: {}]   ;;  %s1497_s3 = inlined_call_operand.vmem [shape: f32[2,6,8,12,12], index: 3, kind: input, shape index: {}]   ;;  %s1498_s4 = inlined_call_operand.vmem [shape: f32[2,10,12,12], index: 4, kind: output, shape index: {0}]   ;;  %s1499_s5 = inlined_call_operand.vmem [shape: f32[2,10,8,12,12], index: 5, kind: output, shape index: {1}]  }
   0x1   :  { %1502 = sst [smem:[#allocation6_spill]] %s1494_s0  ;;  %s1155_s20 = smov 0  }
   0x2   :  { %1503 = sst [smem:[#allocation7_spill]] %s1495_s1  ;;  %s1157_s21 = smov 0  }
   0x3   :  { %s1159_s22 = smov 0  }
   0x4 LB: > { %1504 = sst [smem:[#allocation2_spill]] %s1110_s20  ;;  %s25_s23 = sadd.s32 1, %s1110_s20  ;;  %s1118_s22 = sphi %s1159_s22, %s16_s22   ;;  %s1114_s21 = sphi %s1157_s21, %s1513_s21   ;;  %s1110_s20 = sphi %s1155_s20, %s1512_s20   ;;  %s1106_s19 = sphi %s1153_s19, %s1511_s19   ;;  %s1102_s18 = sphi %s1151_s18, %s1510_s18  }
   0x5   : > { %1505 = sst [smem:[#allocation3_spill]] %s1114_s21  ;;  %s28_s24 = sadd.s32 1, %s1114_s21 }
   0x6   : > { %p26_p0 = scmp.ge.s32.totalorder %s25_s23, 5  ;;  %p1008_p1 = scmp.ge.s32.totalorder %s1118_s22, 1 }
   0x7   : > { %p308_p2 = scmp.lt.s32.totalorder %s1118_s22, 11 }
   0x8   : > { %s1515_s23 = smov (%p26_p0, %s25_s23), 0  ;;  %s1517_s24 = smov (!%p26_p0, %s28_s24), %s1114_s21 }
   0x9   : > { %1506 = sst [smem:[#allocation4_spill]] %s1515_s23  ;;  %p309_p3 = pnand %p1008_p1, %p308_p2 }
   0xa   : > { %p30_p4 = scmp.ge.s32.totalorder %s1517_s24, 2  ;;  %p396_p5 = scmp.lt.s32.totalorder (!%p309_p3), %s1102_s18, 1 }
   0xb   : > { %312 = sbr.rel (%p309_p3) target bundleno = 247 (0xf7), region = 36  ;;  %p399_p6 = scmp.lt.s32.totalorder (!%p309_p3), %s1106_s19, 1 }
   0xc   : > { %s1519_s24 = smov (%p30_p4, %s1517_s24), 0  ;;  %s1017_s25 = sadd.s32 (!%p309_p3), 4294967294, %s1102_s18 }
   0xd   : > { %1507 = sst [smem:[#allocation5_spill]] %s1519_s24  ;;  %s1025_s26 = sshll.u32 (!%p309_p3), %s1102_s18, 1 }
   0xe   : > { %p427_p7 = scmp.gt.s32.totalorder (!%p309_p3), %s1017_s25, 0  ;;  %s1508_s0 = sld [smem:[#allocation6_spill]] (!%p309_p3) }
   0xf   : > { %s1509_s1 = sld [smem:[#allocation7_spill]] (!%p309_p3)  ;;  %p463_p10 = scmp.lt.s32.totalorder (!%p309_p3), %s1025_s26, 9 }
  0x10   : > { %p1031_p11 = scmp.ge.s32.totalorder (!%p309_p3), %s1102_s18, 2 }
  0x12   : > { %s397_s27 = scalar_select %p396_p5, %s1102_s18, 1 }
  0x13   : > { %s1521_s19 = smov (!%p399_p6, %s1106_s19), 1  ;;  %s1525_s25 = smov (!%p427_p7, %s1017_s25), 0 }
  0x14   : > { %s1009_s28 = sshll.u32 %s397_s27, 1  ;;  %s1011_s29 = sshll.u32 %s1521_s19, 3  ;;  %vm506_vm0 = vcmask (!%p1031_p11), 97280   ;;  %vm508_vm1 = vcmask (!%p1031_p11), 93184  }
  0x15   : > { %p401_p8 = scmp.lt.s32.totalorder %s1009_s28, 3  ;;  %s1015_s30 = sshll.u32 %s1521_s19, 6 }
  0x16   : > { %s1035_s6 = smul.u32 12, %s1521_s19  ;;  %s1018_s24 = sshll.u32 %s1525_s25, 1 }
  0x17   : > { %s1523_s28 = smov (!%p401_p8, %s1009_s28), 3  ;;  %s1036_s23 = smul.u32 96, %s1521_s19 }
  0x18   : > { %s1010_s7 = sshll.u32 %s1523_s28, 1  ;;  %s1014_s8 = sshll.u32 %s1523_s28, 4 }
  0x19   : > { %s405_s9 = sadd.s32 %s1011_s29, %s1010_s7  ;;  %s420_s10 = sadd.s32 %s1015_s30, %s1014_s8 }
  0x1a   : > { %s1012_s11 = sshll.u32 %s405_s9, 3  ;;  %s1016_s12 = sshll.u32 %s420_s10, 3 }
  0x1b   : > { %s1195_s15 = scalar_lea.vmem %s1508_s0, %s1012_s11  ;;  %s1200_s27 = scalar_lea.vmem %s1509_s1, %s1016_s12 }
  0x1c   : > { %p432_p9 = scmp.lt.s32.totalorder %s1018_s24, 5  ;;  %s1037_s28 = smul.u32 20, %s1521_s19  ;;  %v488_v0 = vld [vmem:[%s1195_s15 + $0x12] sm:$0xff] (!%p1031_p11)  ;;  %v486_v1 = vld [vmem:[%s1195_s15 + $0x2] sm:$0xff] (!%p1031_p11)  ;;  %v489_v2 = vld [vmem:[%s1195_s15 + $0x1a] sm:$0xf] (!%p1031_p11) }
  0x1d   : > { %s1529_s26 = smov (!%p463_p10, %s1025_s26), 9  ;;  %s1038_s21 = smul.u32 160, %s1521_s19  ;;  %v487_v3 = vld [vmem:[%s1195_s15 + $0xa] sm:$0xf] (!%p1031_p11)  ;;  %v512_v5 = vld [vmem:[%s1200_s27 + $0x2] sm:$0xff] (!%p1031_p11)  ;;  %v514_v7 = vld [vmem:[%s1200_s27 + $0x12] sm:$0xff] (!%p1031_p11) }
  0x1e   : > { %s1527_s24 = smov (!%p432_p9, %s1018_s24), 5  ;;  %s1026_s17 = sshll.u32 %s1529_s26, 1  ;;  %v513_v4 = vld [vmem:[%s1200_s27 + $0xa] sm:$0xf] (!%p1031_p11)  ;;  %v515_v6 = vld [vmem:[%s1200_s27 + $0x1a] sm:$0xf] (!%p1031_p11) }
  0x1f   : > { %s1019_s29 = sshll.u32 %s1527_s24, 1  ;;  %s1023_s30 = sshll.u32 %s1527_s24, 4  ;;  %v517_v8 = vld [vmem:[%s1200_s27 + $0x2a] sm:$0xf] (!%p1031_p11)  ;;  %v516_v9 = vld [vmem:[%s1200_s27 + $0x22] sm:$0xff] (!%p1031_p11)  ;;  %v518_v11 = vld [vmem:[%s1200_s27 + $0x32] sm:$0xff] (!%p1031_p11) }
  0x20   : > { %s436_s7 = sadd.s32 %s1035_s6, %s1019_s29  ;;  %s453_s8 = sadd.s32 %s1036_s23, %s1023_s30  ;;  %v519_v10 = vld [vmem:[%s1200_s27 + $0x3a] sm:$0xf] (!%p1031_p11)  ;;  %v521_v12 = vld [vmem:[%s1200_s27 + $0x4a] sm:$0xf] (!%p1031_p11)  ;;  %v520_v13 = vld [vmem:[%s1200_s27 + $0x42] sm:$0xff] (!%p1031_p11) }
  0x21   : > { %s1020_s9 = sshll.u32 %s436_s7, 3  ;;  %s1024_s10 = sshll.u32 %s453_s8, 3  ;;  %v523_v14 = vld [vmem:[%s1200_s27 + $0x5a] sm:$0xf] (!%p1031_p11)  ;;  %v522_v15 = vld [vmem:[%s1200_s27 + $0x52] sm:$0xff] (!%p1031_p11)  ;;  %v524_v17 = vld [vmem:[%s1200_s27 + $0x62] sm:$0xff] (!%p1031_p11) }
  0x22   : > { %s1207_s14 = scalar_lea.vmem %s1496_s2, %s1020_s9  ;;  %s1212_s16 = scalar_lea.vmem %s1497_s3, %s1024_s10  ;;  %v525_v16 = vld [vmem:[%s1200_s27 + $0x6a] sm:$0xf] (!%p1031_p11)  ;;  %v527_v18 = vld [vmem:[%s1200_s27 + $0x7a] sm:$0xf] (!%p1031_p11)  ;;  %v526_v19 = vld [vmem:[%s1200_s27 + $0x72] sm:$0xff] (!%p1031_p11) }
  0x23   : > { %s1029_s0 = sshll.u32 %s1529_s26, 4  ;;  %s467_s1 = sadd.s32 %s1037_s28, %s1026_s17  ;;  %v529_v20 = vld [vmem:[%s1200_s27 + $0x8a] sm:$0xf] (!%p1031_p11)  ;;  %v528_v21 = vld [vmem:[%s1200_s27 + $0x82] sm:$0xff] (!%p1031_p11)  ;;  %v531_v22 = vld [vmem:[%s1200_s27 + $0x9a] sm:$0xf] (!%p1031_p11) }
  0x24   : > { %s1027_s20 = sshll.u32 %s467_s1, 3  ;;  %s478_s29 = sadd.s32 %s1038_s21, %s1029_s0  ;;  %v530_v23 = vld [vmem:[%s1200_s27 + $0x92] sm:$0xff] (!%p1031_p11)  ;;  %v533_v24 = vld [vmem:[%s1200_s27 + $0xaa] sm:$0xf] (!%p1031_p11)  ;;  %v532_v25 = vld [vmem:[%s1200_s27 + $0xa2] sm:$0xff] (!%p1031_p11) }
  0x25   : > { %s1218_s23 = scalar_lea.vmem %s1498_s4, %s1027_s20  ;;  %s1030_s30 = sshll.u32 %s478_s29, 3  ;;  %v535_v26 = vld [vmem:[%s1200_s27 + $0xba] sm:$0xf] (!%p1031_p11)  ;;  %v534_v27 = vld [vmem:[%s1200_s27 + $0xb2] sm:$0xff] (!%p1031_p11)  ;;  %v537_v28 = vld [vmem:[%s1200_s27 + $0xca] sm:$0xf] (!%p1031_p11) }
  0x26   : > { %s1223_s9 = scalar_lea.vmem %s1499_s5, %s1030_s30  ;;  %485 = sbr.rel (%p1031_p11) target bundleno = 225 (0xe1), region = 40  ;;  %v536_v29 = vld [vmem:[%s1200_s27 + $0xc2] sm:$0xff] (!%p1031_p11)  ;;  %v539_v30 = vld [vmem:[%s1200_s27 + $0xda] sm:$0xf] (!%p1031_p11)  ;;  %v538_v31 = vld [vmem:[%s1200_s27 + $0xd2] sm:$0xff] (!%p1031_p11) }
  0x27   : > { %s1120_s0 = smov (!%p1031_p11), 126   ;;  %v541_v32 = vld [vmem:[%s1200_s27 + $0xea] sm:$0xf] (!%p1031_p11)  ;;  %v540_v33 = vld [vmem:[%s1200_s27 + $0xe2] sm:$0xff] (!%p1031_p11)  ;;  %v543_v34 = vld [vmem:[%s1200_s27 + $0xfa] sm:$0xf] (!%p1031_p11) }
  0x28   : > { %498 = vrot.lane.b32.xlu1 (!%p1031_p11), %v488_v0, %s1120_s0  ;;  %494 = vrot.lane.b32.xlu0 (!%p1031_p11), %v486_v1, %s1120_s0  ;;  %v542_v35 = vld [vmem:[%s1200_s27 + $0xf2] sm:$0xff] (!%p1031_p11) }
  0x2c   : > { %500 = vrot.lane.b32.xlu1 (!%p1031_p11), %v489_v2, %s1120_s0  ;;  %496 = vrot.lane.b32.xlu0 (!%p1031_p11), %v487_v3, %s1120_s0 }
  0x30   : > { %578 = vrot.lane.b32.xlu1 %v513_v4, %s1120_s0  ;;  %576 = vrot.lane.b32.xlu0 %v512_v5, %s1120_s0 }
  0x34   : > { %582 = vrot.lane.b32.xlu1 %v515_v6, %s1120_s0  ;;  %580 = vrot.lane.b32.xlu0 %v514_v7, %s1120_s0 }
  0x38   : > { %586 = vrot.lane.b32.xlu1 %v517_v8, %s1120_s0  ;;  %584 = vrot.lane.b32.xlu0 %v516_v9, %s1120_s0 }
  0x3c   : > { %590 = vrot.lane.b32.xlu1 %v519_v10, %s1120_s0  ;;  %588 = vrot.lane.b32.xlu0 %v518_v11, %s1120_s0 }
  0x40   : > { %594 = vrot.lane.b32.xlu1 %v521_v12, %s1120_s0  ;;  %592 = vrot.lane.b32.xlu0 %v520_v13, %s1120_s0 }
  0x44   : > { %598 = vrot.lane.b32.xlu1 %v523_v14, %s1120_s0  ;;  %596 = vrot.lane.b32.xlu0 %v522_v15, %s1120_s0 }
  0x48   : > { %602 = vrot.lane.b32.xlu1 %v525_v16, %s1120_s0  ;;  %600 = vrot.lane.b32.xlu0 %v524_v17, %s1120_s0 }
  0x4c   : > { %606 = vrot.lane.b32.xlu1 %v527_v18, %s1120_s0  ;;  %604 = vrot.lane.b32.xlu0 %v526_v19, %s1120_s0 }
  0x50   : > { %610 = vrot.lane.b32.xlu1 %v529_v20, %s1120_s0  ;;  %608 = vrot.lane.b32.xlu0 %v528_v21, %s1120_s0 }
  0x54   : > { %614 = vrot.lane.b32.xlu1 %v531_v22, %s1120_s0  ;;  %612 = vrot.lane.b32.xlu0 %v530_v23, %s1120_s0 }
  0x58   : > { %618 = vrot.lane.b32.xlu1 %v533_v24, %s1120_s0  ;;  %616 = vrot.lane.b32.xlu0 %v532_v25, %s1120_s0 }
  0x5c   : > { %622 = vrot.lane.b32.xlu1 %v535_v26, %s1120_s0  ;;  %620 = vrot.lane.b32.xlu0 %v534_v27, %s1120_s0 }
  0x60   : > { %626 = vrot.lane.b32.xlu1 %v537_v28, %s1120_s0  ;;  %624 = vrot.lane.b32.xlu0 %v536_v29, %s1120_s0 }
  0x64   : > { %630 = vrot.lane.b32.xlu1 %v539_v30, %s1120_s0  ;;  %628 = vrot.lane.b32.xlu0 %v538_v31, %s1120_s0 }
  0x68   : > { %634 = vrot.lane.b32.xlu1 %v541_v32, %s1120_s0  ;;  %632 = vrot.lane.b32.xlu0 %v540_v33, %s1120_s0 }
  0x6c   : > { %638 = vrot.lane.b32.xlu1 %v543_v34, %s1120_s0  ;;  %636 = vrot.lane.b32.xlu0 %v542_v35, %s1120_s0 }
  0x9a   : > { %v499_v36 = vpop.permute.xlu1 %498  ;;  %v495_v37 = vpop.permute.xlu0 %494 }
  0x9b   : > { %510 = vst.msk [vmem:[%s1218_s23 + $0x10] sm:$0xff] %vm506_vm0, %v499_v36  ;;  %507 = vst.msk [vmem:[%s1218_s23] sm:$0xff] %vm506_vm0, %v495_v37 }
  0x9e   : > { %v501_v38 = vpop.permute.xlu1 %500  ;;  %v497_v39 = vpop.permute.xlu0 %496 }
  0x9f   : > { %511 = vst.msk [vmem:[%s1218_s23 + $0x18] sm:$0xf] %vm508_vm1, %v501_v38  ;;  %509 = vst.msk [vmem:[%s1218_s23 + $0x8] sm:$0xf] %vm508_vm1, %v497_v39 }
  0xa2   : > { %v579_v40 = vpop.permute.xlu1 %578  ;;  %v577_v41 = vpop.permute.xlu0 %576 }
  0xa3   : > { %673 = vst.msk [vmem:[%s1223_s9 + $0x8] sm:$0xf] %vm508_vm1, %v579_v40 }
  0xa4   : > { %672 = vst.msk [vmem:[%s1223_s9] sm:$0xff] %vm506_vm0, %v577_v41 }
  0xa6   : > { %v583_v42 = vpop.permute.xlu1 %582  ;;  %v581_v43 = vpop.permute.xlu0 %580 }
  0xa7   : > { %675 = vst.msk [vmem:[%s1223_s9 + $0x18] sm:$0xf] %vm508_vm1, %v583_v42 }
  0xa8   : > { %674 = vst.msk [vmem:[%s1223_s9 + $0x10] sm:$0xff] %vm506_vm0, %v581_v43 }
  0xaa   : > { %v587_v44 = vpop.permute.xlu1 %586  ;;  %v585_v45 = vpop.permute.xlu0 %584 }
  0xab   : > { %677 = vst.msk [vmem:[%s1223_s9 + $0x28] sm:$0xf] %vm508_vm1, %v587_v44 }
  0xac   : > { %676 = vst.msk [vmem:[%s1223_s9 + $0x20] sm:$0xff] %vm506_vm0, %v585_v45 }
  0xae   : > { %v591_v46 = vpop.permute.xlu1 %590  ;;  %v589_v47 = vpop.permute.xlu0 %588 }
  0xaf   : > { %679 = vst.msk [vmem:[%s1223_s9 + $0x38] sm:$0xf] %vm508_vm1, %v591_v46 }
  0xb0   : > { %678 = vst.msk [vmem:[%s1223_s9 + $0x30] sm:$0xff] %vm506_vm0, %v589_v47 }
  0xb2   : > { %v595_v48 = vpop.permute.xlu1 %594  ;;  %v593_v49 = vpop.permute.xlu0 %592 }
  0xb3   : > { %681 = vst.msk [vmem:[%s1223_s9 + $0x48] sm:$0xf] %vm508_vm1, %v595_v48 }
  0xb4   : > { %680 = vst.msk [vmem:[%s1223_s9 + $0x40] sm:$0xff] %vm506_vm0, %v593_v49 }
  0xb6   : > { %v599_v50 = vpop.permute.xlu1 %598  ;;  %v597_v51 = vpop.permute.xlu0 %596 }
  0xb7   : > { %683 = vst.msk [vmem:[%s1223_s9 + $0x58] sm:$0xf] %vm508_vm1, %v599_v50 }
  0xb8   : > { %682 = vst.msk [vmem:[%s1223_s9 + $0x50] sm:$0xff] %vm506_vm0, %v597_v51 }
  0xba   : > { %v603_v52 = vpop.permute.xlu1 %602  ;;  %v601_v53 = vpop.permute.xlu0 %600 }
  0xbb   : > { %685 = vst.msk [vmem:[%s1223_s9 + $0x68] sm:$0xf] %vm508_vm1, %v603_v52 }
  0xbc   : > { %684 = vst.msk [vmem:[%s1223_s9 + $0x60] sm:$0xff] %vm506_vm0, %v601_v53 }
  0xbe   : > { %v607_v54 = vpop.permute.xlu1 %606  ;;  %v605_v55 = vpop.permute.xlu0 %604 }
  0xbf   : > { %687 = vst.msk [vmem:[%s1223_s9 + $0x78] sm:$0xf] %vm508_vm1, %v607_v54 }
  0xc0   : > { %686 = vst.msk [vmem:[%s1223_s9 + $0x70] sm:$0xff] %vm506_vm0, %v605_v55 }
  0xc2   : > { %v611_v56 = vpop.permute.xlu1 %610  ;;  %v609_v57 = vpop.permute.xlu0 %608 }
  0xc3   : > { %689 = vst.msk [vmem:[%s1223_s9 + $0x88] sm:$0xf] %vm508_vm1, %v611_v56 }
  0xc4   : > { %688 = vst.msk [vmem:[%s1223_s9 + $0x80] sm:$0xff] %vm506_vm0, %v609_v57 }
  0xc6   : > { %v615_v58 = vpop.permute.xlu1 %614  ;;  %v613_v59 = vpop.permute.xlu0 %612 }
  0xc7   : > { %691 = vst.msk [vmem:[%s1223_s9 + $0x98] sm:$0xf] %vm508_vm1, %v615_v58 }
  0xc8   : > { %690 = vst.msk [vmem:[%s1223_s9 + $0x90] sm:$0xff] %vm506_vm0, %v613_v59 }
  0xca   : > { %v619_v60 = vpop.permute.xlu1 %618  ;;  %v617_v61 = vpop.permute.xlu0 %616 }
  0xcb   : > { %693 = vst.msk [vmem:[%s1223_s9 + $0xa8] sm:$0xf] %vm508_vm1, %v619_v60 }
  0xcc   : > { %692 = vst.msk [vmem:[%s1223_s9 + $0xa0] sm:$0xff] %vm506_vm0, %v617_v61 }
  0xce   : > { %v623_v62 = vpop.permute.xlu1 %622  ;;  %v621_v63 = vpop.permute.xlu0 %620 }
  0xcf   : > { %695 = vst.msk [vmem:[%s1223_s9 + $0xb8] sm:$0xf] %vm508_vm1, %v623_v62 }
  0xd0   : > { %694 = vst.msk [vmem:[%s1223_s9 + $0xb0] sm:$0xff] %vm506_vm0, %v621_v63 }
  0xd2   : > { %v627_v0 = vpop.permute.xlu1 %626  ;;  %v625_v1 = vpop.permute.xlu0 %624 }
  0xd3   : > { %697 = vst.msk [vmem:[%s1223_s9 + $0xc8] sm:$0xf] %vm508_vm1, %v627_v0 }
  0xd4   : > { %696 = vst.msk [vmem:[%s1223_s9 + $0xc0] sm:$0xff] %vm506_vm0, %v625_v1 }
  0xd6   : > { %v631_v2 = vpop.permute.xlu1 %630  ;;  %v629_v3 = vpop.permute.xlu0 %628 }
  0xd7   : > { %699 = vst.msk [vmem:[%s1223_s9 + $0xd8] sm:$0xf] %vm508_vm1, %v631_v2 }
  0xd8   : > { %698 = vst.msk [vmem:[%s1223_s9 + $0xd0] sm:$0xff] %vm506_vm0, %v629_v3 }
  0xda   : > { %v635_v4 = vpop.permute.xlu1 %634  ;;  %v633_v5 = vpop.permute.xlu0 %632 }
  0xdb   : > { %701 = vst.msk [vmem:[%s1223_s9 + $0xe8] sm:$0xf] %vm508_vm1, %v635_v4 }
  0xdc   : > { %700 = vst.msk [vmem:[%s1223_s9 + $0xe0] sm:$0xff] %vm506_vm0, %v633_v5 }
  0xde   : > { %v639_v6 = vpop.permute.xlu1 %638  ;;  %v637_v7 = vpop.permute.xlu0 %636 }
  0xdf   : > { %703 = vst.msk [vmem:[%s1223_s9 + $0xf8] sm:$0xf] %vm508_vm1, %v639_v6 }
  0xe0   : > { %702 = vst.msk [vmem:[%s1223_s9 + $0xf0] sm:$0xff] %vm506_vm0, %v637_v7 }
  0xe1 PF: > { %p1032_p12 = scmp.lt.s32.totalorder %s1102_s18, 2 }
  0xe2   : > { %v708_v8 = vld [vmem:[%s1207_s14] sm:$0xff] (!%p1032_p12)  ;;  %vm712_vm2 = vcmask (!%p1032_p12), 97280   ;;  %v709_v9 = vld [vmem:[%s1207_s14 + $0x8] sm:$0xf] (!%p1032_p12)  ;;  %vm714_vm3 = vcmask (!%p1032_p12), 93184   ;;  %v710_v10 = vld [vmem:[%s1207_s14 + $0x10] sm:$0xff] (!%p1032_p12) }
  0xe3   : > { %707 = sbr.rel (%p1032_p12) target bundleno = 247 (0xf7), region = 44  ;;  %713 = vst.msk [vmem:[%s1218_s23] sm:$0xff] (!%p1032_p12), %vm712_vm2, %v708_v8  ;;  %716 = vst.msk [vmem:[%s1218_s23 + $0x10] sm:$0xff] (!%p1032_p12), %vm712_vm2, %v710_v10  ;;  %v711_v11 = vld [vmem:[%s1207_s14 + $0x18] sm:$0xf] (!%p1032_p12)  ;;  %v718_v12 = vld [vmem:[%s1212_s16] sm:$0xff] (!%p1032_p12) }
  0xe4   : > { %715 = vst.msk [vmem:[%s1218_s23 + $0x8] sm:$0xf] (!%p1032_p12), %vm714_vm3, %v709_v9  ;;  %v719_v13 = vld [vmem:[%s1212_s16 + $0x8] sm:$0xf] (!%p1032_p12)  ;;  %717 = vst.msk [vmem:[%s1218_s23 + $0x18] sm:$0xf] (!%p1032_p12), %vm714_vm3, %v711_v11 }
  0xe5   : > { %750 = vst.msk [vmem:[%s1223_s9] sm:$0xff] (!%p1032_p12), %vm712_vm2, %v718_v12  ;;  %v720_v14 = vld [vmem:[%s1212_s16 + $0x10] sm:$0xff] (!%p1032_p12)  ;;  %v721_v15 = vld [vmem:[%s1212_s16 + $0x18] sm:$0xf] (!%p1032_p12)  ;;  %v722_v16 = vld [vmem:[%s1212_s16 + $0x20] sm:$0xff] (!%p1032_p12) }
  0xe6   : > { %751 = vst.msk [vmem:[%s1223_s9 + $0x8] sm:$0xf] (!%p1032_p12), %vm714_vm3, %v719_v13  ;;  %753 = vst.msk [vmem:[%s1223_s9 + $0x18] sm:$0xf] (!%p1032_p12), %vm714_vm3, %v721_v15  ;;  %v723_v17 = vld [vmem:[%s1212_s16 + $0x28] sm:$0xf] (!%p1032_p12) }
  0xe7   : > { %752 = vst.msk [vmem:[%s1223_s9 + $0x10] sm:$0xff] (!%p1032_p12), %vm712_vm2, %v720_v14  ;;  %754 = vst.msk [vmem:[%s1223_s9 + $0x20] sm:$0xff] (!%p1032_p12), %vm712_vm2, %v722_v16  ;;  %v724_v18 = vld [vmem:[%s1212_s16 + $0x30] sm:$0xff] (!%p1032_p12)  ;;  %v725_v19 = vld [vmem:[%s1212_s16 + $0x38] sm:$0xf] (!%p1032_p12) }
  0xe8   : > { %755 = vst.msk [vmem:[%s1223_s9 + $0x28] sm:$0xf] (!%p1032_p12), %vm714_vm3, %v723_v17  ;;  %757 = vst.msk [vmem:[%s1223_s9 + $0x38] sm:$0xf] (!%p1032_p12), %vm714_vm3, %v725_v19  ;;  %v726_v20 = vld [vmem:[%s1212_s16 + $0x40] sm:$0xff] (!%p1032_p12)  ;;  %v728_v22 = vld [vmem:[%s1212_s16 + $0x50] sm:$0xff] (!%p1032_p12) }
  0xe9   : > { %756 = vst.msk [vmem:[%s1223_s9 + $0x30] sm:$0xff] (!%p1032_p12), %vm712_vm2, %v724_v18  ;;  %v727_v21 = vld [vmem:[%s1212_s16 + $0x48] sm:$0xf] (!%p1032_p12)  ;;  %758 = vst.msk [vmem:[%s1223_s9 + $0x40] sm:$0xff] (!%p1032_p12), %vm712_vm2, %v726_v20  ;;  %v729_v23 = vld [vmem:[%s1212_s16 + $0x58] sm:$0xf] (!%p1032_p12) }
  0xea   : > { %759 = vst.msk [vmem:[%s1223_s9 + $0x48] sm:$0xf] %vm714_vm3, %v727_v21  ;;  %v730_v24 = vld [vmem:[%s1212_s16 + $0x60] sm:$0xff]  ;;  %v731_v25 = vld [vmem:[%s1212_s16 + $0x68] sm:$0xf]  ;;  %v732_v26 = vld [vmem:[%s1212_s16 + $0x70] sm:$0xff] }
  0xeb   : > { %760 = vst.msk [vmem:[%s1223_s9 + $0x50] sm:$0xff] %vm712_vm2, %v728_v22  ;;  %762 = vst.msk [vmem:[%s1223_s9 + $0x60] sm:$0xff] %vm712_vm2, %v730_v24  ;;  %v733_v27 = vld [vmem:[%s1212_s16 + $0x78] sm:$0xf]  ;;  %v734_v28 = vld [vmem:[%s1212_s16 + $0x80] sm:$0xff] }
  0xec   : > { %761 = vst.msk [vmem:[%s1223_s9 + $0x58] sm:$0xf] %vm714_vm3, %v729_v23  ;;  %763 = vst.msk [vmem:[%s1223_s9 + $0x68] sm:$0xf] %vm714_vm3, %v731_v25  ;;  %v735_v29 = vld [vmem:[%s1212_s16 + $0x88] sm:$0xf] }
  0xed   : > { %764 = vst.msk [vmem:[%s1223_s9 + $0x70] sm:$0xff] %vm712_vm2, %v732_v26  ;;  %766 = vst.msk [vmem:[%s1223_s9 + $0x80] sm:$0xff] %vm712_vm2, %v734_v28  ;;  %v736_v30 = vld [vmem:[%s1212_s16 + $0x90] sm:$0xff]  ;;  %v737_v31 = vld [vmem:[%s1212_s16 + $0x98] sm:$0xf] }
  0xee   : > { %765 = vst.msk [vmem:[%s1223_s9 + $0x78] sm:$0xf] %vm714_vm3, %v733_v27  ;;  %767 = vst.msk [vmem:[%s1223_s9 + $0x88] sm:$0xf] %vm714_vm3, %v735_v29  ;;  %v738_v32 = vld [vmem:[%s1212_s16 + $0xa0] sm:$0xff]  ;;  %v740_v34 = vld [vmem:[%s1212_s16 + $0xb0] sm:$0xff] }
  0xef   : > { %768 = vst.msk [vmem:[%s1223_s9 + $0x90] sm:$0xff] %vm712_vm2, %v736_v30  ;;  %v739_v33 = vld [vmem:[%s1212_s16 + $0xa8] sm:$0xf]  ;;  %770 = vst.msk [vmem:[%s1223_s9 + $0xa0] sm:$0xff] %vm712_vm2, %v738_v32  ;;  %v741_v35 = vld [vmem:[%s1212_s16 + $0xb8] sm:$0xf] }
  0xf0   : > { %769 = vst.msk [vmem:[%s1223_s9 + $0x98] sm:$0xf] %vm714_vm3, %v737_v31  ;;  %771 = vst.msk [vmem:[%s1223_s9 + $0xa8] sm:$0xf] %vm714_vm3, %v739_v33  ;;  %v742_v36 = vld [vmem:[%s1212_s16 + $0xc0] sm:$0xff]  ;;  %v744_v38 = vld [vmem:[%s1212_s16 + $0xd0] sm:$0xff] }
  0xf1   : > { %772 = vst.msk [vmem:[%s1223_s9 + $0xb0] sm:$0xff] %vm712_vm2, %v740_v34  ;;  %v743_v37 = vld [vmem:[%s1212_s16 + $0xc8] sm:$0xf]  ;;  %774 = vst.msk [vmem:[%s1223_s9 + $0xc0] sm:$0xff] %vm712_vm2, %v742_v36  ;;  %v745_v39 = vld [vmem:[%s1212_s16 + $0xd8] sm:$0xf] }
  0xf2   : > { %773 = vst.msk [vmem:[%s1223_s9 + $0xb8] sm:$0xf] %vm714_vm3, %v741_v35  ;;  %775 = vst.msk [vmem:[%s1223_s9 + $0xc8] sm:$0xf] %vm714_vm3, %v743_v37  ;;  %v746_v40 = vld [vmem:[%s1212_s16 + $0xe0] sm:$0xff]  ;;  %v748_v42 = vld [vmem:[%s1212_s16 + $0xf0] sm:$0xff] }
  0xf3   : > { %776 = vst.msk [vmem:[%s1223_s9 + $0xd0] sm:$0xff] %vm712_vm2, %v744_v38  ;;  %778 = vst.msk [vmem:[%s1223_s9 + $0xe0] sm:$0xff] %vm712_vm2, %v746_v40  ;;  %v747_v41 = vld [vmem:[%s1212_s16 + $0xe8] sm:$0xf]  ;;  %v749_v43 = vld [vmem:[%s1212_s16 + $0xf8] sm:$0xf] }
  0xf4   : > { %777 = vst.msk [vmem:[%s1223_s9 + $0xd8] sm:$0xf] %vm714_vm3, %v745_v39  ;;  %779 = vst.msk [vmem:[%s1223_s9 + $0xe8] sm:$0xf] %vm714_vm3, %v747_v41 }
  0xf5   : > { %780 = vst.msk [vmem:[%s1223_s9 + $0xf0] sm:$0xff] %vm712_vm2, %v748_v42 }
  0xf6   : > { %781 = vst.msk [vmem:[%s1223_s9 + $0xf8] sm:$0xf] %vm714_vm3, %v749_v43 }
  0xf7 PF: > { %s16_s22 = sadd.s32 1, %s1118_s22   ;;  %s1510_s18 = sld [smem:[#allocation2_spill]] }
  0xf8   : > { %p13_p13 = scmp.ge.s32.totalorder %s16_s22, 12   ;;  %s1511_s19 = sld [smem:[#allocation3_spill]] }
  0xf9   : > { %s1512_s20 = sld [smem:[#allocation4_spill]]  ;;  %s1513_s21 = sld [smem:[#allocation5_spill]] }
  0xfa   :  { %15 = sbr.rel (!%p13_p13) target bundleno = 4 (0x4), region = 95 }

</bundles_post_ra>
